<compile_context>
chip_gen: v6e
topology: v6e:2x2x1
jax: 0.10.0
libtpu: 0.0.40
codegen_flags: <defaults>
</compile_context>

<pallas_src>
import functools
import math

import jax
import jax.numpy as jnp
from jax.experimental import pallas as pl
from jax.experimental.pallas import tpu as pltpu

LANE = 128
SUBLANE = 8
CHUNK = LANE * SUBLANE          # only alignment we ever pad to (1024 elements)
MAX_BLOCK_ROWS = 4096           # 4096*128*4B = 2 MiB/input tile


def _softplus(x):
    # numerically stable softplus; logsigmoid(z) == -softplus(-z)
    return jnp.maximum(x, 0.0) + jnp.log1p(jnp.exp(-jnp.abs(x)))


def tobit_mle_kernel(var_r_ref, score_r_ref, score_s_ref, target_r_ref,
                     target_s_ref, out_ref, *, C, rho, inv_den, n_valid,
                     block_rows):
    i = pl.program_id(0)

    # Inputs arrive in the caller's dtype; upcast in-kernel (free VPU op).
    var_r = var_r_ref[...].astype(jnp.float32)
    score_r = score_r_ref[...].astype(jnp.float32)
    score_s = score_s_ref[...].astype(jnp.float32)
    target_r = target_r_ref[...].astype(jnp.float32)
    target_s = target_s_ref[...].astype(jnp.float32)

    # Tobit / censored-regression MLE terms (weight=None branch).
    val_mle = score_r * score_r - 2.0 * target_r * score_r
    val_var = C * var_r
    # 1 - sigmoid(x) == sigmoid(-x) == exp(-softplus(x)); avoids the f32 divide
    # and never overflows, while matching log(1 - sigmoid(x) + 1e-8) exactly.
    val_unsel = jnp.log(jnp.exp(-_softplus(score_s)) + 1e-8)
    z = (score_s + rho * (target_r - score_r)) * inv_den
    val_sel = -_softplus(-z)  # logsigmoid(z)

    loss = target_s * (val_mle + val_var - val_sel) - (1.0 - target_s) * val_unsel

    def partial_sum(x):
        # (block_rows, 128) -> (8, 128): tile-aligned VPU adds only (no
        # cross-lane XLU reduce), unmasked full-vreg output store.
        return jnp.sum(x.reshape(block_rows // SUBLANE, SUBLANE, LANE), axis=0)

    block_elems = block_rows * LANE
    block_start = i * block_elems              # int32: assumes n < 2**31
    is_interior = block_start + block_elems <= n_valid

    @pl.when(is_interior)
    def _():
        # Fast path: every element of this tile is valid -> no mask work.
        out_ref[...] = partial_sum(loss)

    @pl.when(jnp.logical_not(is_interior))
    def _():
        # Ragged tail: zero out zero-padded elements and any Pallas OOB
        # garbage of the partial last block before reducing.
        rem = n_valid - block_start
        row_ids = jax.lax.broadcasted_iota(jnp.int32, (block_rows, LANE), 0)
        lane_ids = jax.lax.broadcasted_iota(jnp.int32, (block_rows, LANE), 1)
        local_idx = row_ids * LANE + lane_ids
        out_ref[...] = partial_sum(jnp.where(local_idx < rem, loss, 0.0))


def tobit_mle_loss(var_r, score_r, score_s, target_r, target_s, *, C=5, rho=0.2):
    flats = [jnp.ravel(a) for a in (var_r, score_r, score_s, target_r, target_s)]
    n = int(flats[0].size)
    if n == 0:
        return jnp.float32(jnp.nan)   # torch .mean() of an empty tensor is NaN

    # Pad only to the next 1024-element (8x128) boundary, never to a
    # block_rows multiple; skip the pad entirely when already aligned.
    padded_n = -(-n // CHUNK) * CHUNK
    if padded_n != n:
        flats = [jnp.pad(f, (0, padded_n - n)) for f in flats]
    rows = padded_n // LANE              # multiple of SUBLANE by construction
    xs = [f.reshape(rows, LANE) for f in flats]

    # Tile selection: large tiles for low per-step overhead, but keep >= 2
    # (roughly balanced) grid steps when possible so v7x's 2 TCs both work.
    if rows > MAX_BLOCK_ROWS:
        block_rows = MAX_BLOCK_ROWS
    else:
        half = -(-rows // 2)
        block_rows = max(SUBLANE, -(-half // SUBLANE) * SUBLANE)
    grid = pl.cdiv(rows, block_rows)     # ragged last block masked in-kernel

    in_spec = pl.BlockSpec((block_rows, LANE), lambda i: (i, 0))
    out_spec = pl.BlockSpec((None, SUBLANE, LANE), lambda i: (i, 0, 0))

    kernel = functools.partial(
        tobit_mle_kernel,
        C=float(C),
        rho=float(rho),
        inv_den=float(1.0 / math.sqrt(1.0 - float(rho) ** 2)),
        n_valid=n,
        block_rows=int(block_rows),
    )

    in_bytes = sum(int(x.size) * x.dtype.itemsize for x in xs)
    partials = pl.pallas_call(
        kernel,
        out_shape=jax.ShapeDtypeStruct((grid, SUBLANE, LANE), jnp.float32),
        grid=(grid,),
        in_specs=[in_spec] * 5,
        out_specs=out_spec,
        compiler_params=pltpu.CompilerParams(
            dimension_semantics=("parallel",),
            vmem_limit_bytes=48 * 1024 * 1024,
        ),
        cost_estimate=pl.CostEstimate(
            flops=25 * padded_n,
            transcendentals=6 * padded_n,
            bytes_accessed=in_bytes + grid * SUBLANE * LANE * 4,
        ),
    )(*xs)

    # Tiny cross-lane reduce + single divide by the true N stay in XLA so the
    # kernel grid can remain fully "parallel" (no serial accumulator).
    return jnp.sum(partials) / jnp.float32(n)


def _reference(var_r, score_r, score_s, target_r, target_s, C=5, rho=0.2):
    val_mle = jnp.square(score_r) - 2.0 * target_r * score_r
    val_var = C * var_r
    val_unsel = jnp.log(1.0 - jax.nn.sigmoid(score_s) + 1e-8)
    num = score_s + rho * (target_r - score_r)
    den = jnp.sqrt(1.0 - rho ** 2)
    val_sel = jax.nn.log_sigmoid(num / den)
    return jnp.mean(target_s * val_mle + target_s * val_var
                    - target_s * val_sel - (1.0 - target_s) * val_unsel)


if __name__ == "__main__":
    key = jax.random.PRNGKey(0)
    # N deliberately not a multiple of 1024: exercises the 1024-pad + masked
    # last block, and yields a 2-step parallel grid (one per v7x TensorCore).
    N = 2000
    ks = jax.random.split(key, 5)
    var_r = jnp.abs(jax.random.normal(ks[0], (N,), jnp.float32))
    score_r = jax.random.normal(ks[1], (N,), jnp.float32)
    score_s = jax.random.normal(ks[2], (N,), jnp.float32)
    target_r = jax.random.normal(ks[3], (N,), jnp.float32)
    target_s = (jax.random.uniform(ks[4], (N,)) > 0.5).astype(jnp.float32)

    out = tobit_mle_loss(var_r, score_r, score_s, target_r, target_s, C=5, rho=0.2)
    out = jax.block_until_ready(out)

    ref = _reference(var_r, score_r, score_s, target_r, target_s, C=5, rho=0.2)
    assert out.shape == ()
    assert jnp.abs(out - ref) < 1e-4 * (1.0 + jnp.abs(ref)), (out, ref)

    print("KERNEL_OK")
</pallas_src>

<mosaic_0001>
module attributes {stable_mosaic.version = 11 : i64} {
  func.func @tobit_mle_kernel(%arg0: i32, %arg1: memref<8x128xf32, #tpu.memory_space<vmem>>, %arg2: memref<8x128xf32, #tpu.memory_space<vmem>>, %arg3: memref<8x128xf32, #tpu.memory_space<vmem>>, %arg4: memref<8x128xf32, #tpu.memory_space<vmem>>, %arg5: memref<8x128xf32, #tpu.memory_space<vmem>>, %arg6: memref<1x8x128xf32, #tpu.memory_space<vmem>>) attributes {dimension_semantics = [#tpu.dimension_semantics<parallel>], iteration_bounds = array<i64: 2>, scalar_prefetch = 0 : i64, scratch_operands = 0 : i64, tpu.core_type = #tpu.core_type<tc>, window_params = [{transform_indices = @transform_0, window_bounds = array<i64: 8, 128>}, {transform_indices = @transform_1, window_bounds = array<i64: 8, 128>}, {transform_indices = @transform_2, window_bounds = array<i64: 8, 128>}, {transform_indices = @transform_3, window_bounds = array<i64: 8, 128>}, {transform_indices = @transform_4, window_bounds = array<i64: 8, 128>}, {transform_indices = @transform_5, window_bounds = array<i64: 1, 8, 128>}]} {
    %c0 = arith.constant 0 : index
    %c0_0 = arith.constant 0 : index
    %0 = vector.load %arg1[%c0, %c0_0] : memref<8x128xf32, #tpu.memory_space<vmem>>, vector<8x128xf32>
    %c0_1 = arith.constant 0 : index
    %c0_2 = arith.constant 0 : index
    %1 = vector.load %arg2[%c0_1, %c0_2] : memref<8x128xf32, #tpu.memory_space<vmem>>, vector<8x128xf32>
    %c0_3 = arith.constant 0 : index
    %c0_4 = arith.constant 0 : index
    %2 = vector.load %arg3[%c0_3, %c0_4] : memref<8x128xf32, #tpu.memory_space<vmem>>, vector<8x128xf32>
    %c0_5 = arith.constant 0 : index
    %c0_6 = arith.constant 0 : index
    %3 = vector.load %arg4[%c0_5, %c0_6] : memref<8x128xf32, #tpu.memory_space<vmem>>, vector<8x128xf32>
    %c0_7 = arith.constant 0 : index
    %c0_8 = arith.constant 0 : index
    %4 = vector.load %arg5[%c0_7, %c0_8] : memref<8x128xf32, #tpu.memory_space<vmem>>, vector<8x128xf32>
    %5 = arith.mulf %1, %1 : vector<8x128xf32>
    %cst = arith.constant 2.000000e+00 : f32
    %6 = vector.broadcast %cst : f32 to vector<8x128xf32>
    %7 = arith.mulf %6, %3 : vector<8x128xf32>
    %8 = arith.mulf %7, %1 : vector<8x128xf32>
    %9 = arith.subf %5, %8 : vector<8x128xf32>
    %cst_9 = arith.constant 5.000000e+00 : f32
    %10 = vector.broadcast %cst_9 : f32 to vector<8x128xf32>
    %11 = arith.mulf %10, %0 : vector<8x128xf32>
    %cst_10 = arith.constant 0.000000e+00 : f32
    %12 = vector.broadcast %cst_10 : f32 to vector<8x128xf32>
    %13 = arith.maximumf %2, %12 : vector<8x128xf32>
    %14 = math.absf %2 : vector<8x128xf32>
    %cst_11 = arith.constant 0.000000e+00 : f32
    %15 = vector.broadcast %cst_11 : f32 to vector<8x128xf32>
    %16 = arith.subf %15, %14 : vector<8x128xf32>
    %17 = math.exp %16 : vector<8x128xf32>
    %18 = math.log1p %17 : vector<8x128xf32>
    %19 = arith.addf %13, %18 : vector<8x128xf32>
    %cst_12 = arith.constant 0.000000e+00 : f32
    %20 = vector.broadcast %cst_12 : f32 to vector<8x128xf32>
    %21 = arith.subf %20, %19 : vector<8x128xf32>
    %22 = math.exp %21 : vector<8x128xf32>
    %cst_13 = arith.constant 9.99999993E-9 : f32
    %23 = vector.broadcast %cst_13 : f32 to vector<8x128xf32>
    %24 = arith.addf %22, %23 : vector<8x128xf32>
    %25 = math.log %24 : vector<8x128xf32>
    %26 = arith.subf %3, %1 : vector<8x128xf32>
    %cst_14 = arith.constant 2.000000e-01 : f32
    %27 = vector.broadcast %cst_14 : f32 to vector<8x128xf32>
    %28 = arith.mulf %27, %26 : vector<8x128xf32>
    %29 = arith.addf %2, %28 : vector<8x128xf32>
    %cst_15 = arith.constant 1.0206207 : f32
    %30 = vector.broadcast %cst_15 : f32 to vector<8x128xf32>
    %31 = arith.mulf %29, %30 : vector<8x128xf32>
    %cst_16 = arith.constant 0.000000e+00 : f32
    %32 = vector.broadcast %cst_16 : f32 to vector<8x128xf32>
    %33 = arith.subf %32, %31 : vector<8x128xf32>
    %cst_17 = arith.constant 0.000000e+00 : f32
    %34 = vector.broadcast %cst_17 : f32 to vector<8x128xf32>
    %35 = arith.maximumf %33, %34 : vector<8x128xf32>
    %36 = math.absf %33 : vector<8x128xf32>
    %cst_18 = arith.constant 0.000000e+00 : f32
    %37 = vector.broadcast %cst_18 : f32 to vector<8x128xf32>
    %38 = arith.subf %37, %36 : vector<8x128xf32>
    %39 = math.exp %38 : vector<8x128xf32>
    %40 = math.log1p %39 : vector<8x128xf32>
    %41 = arith.addf %35, %40 : vector<8x128xf32>
    %cst_19 = arith.constant 0.000000e+00 : f32
    %42 = vector.broadcast %cst_19 : f32 to vector<8x128xf32>
    %43 = arith.subf %42, %41 : vector<8x128xf32>
    %44 = arith.addf %9, %11 : vector<8x128xf32>
    %45 = arith.subf %44, %43 : vector<8x128xf32>
    %46 = arith.mulf %4, %45 : vector<8x128xf32>
    %cst_20 = arith.constant 1.000000e+00 : f32
    %47 = vector.broadcast %cst_20 : f32 to vector<8x128xf32>
    %48 = arith.subf %47, %4 : vector<8x128xf32>
    %49 = arith.mulf %48, %25 : vector<8x128xf32>
    %50 = arith.subf %46, %49 : vector<8x128xf32>
    %c1024_i32 = arith.constant 1024 : i32
    %51 = arith.muli %arg0, %c1024_i32 : i32
    %c1024_i32_21 = arith.constant 1024 : i32
    %52 = arith.addi %51, %c1024_i32_21 : i32
    %c2000_i32 = arith.constant 2000 : i32
    %53 = arith.cmpi sle, %52, %c2000_i32 : i32
    %54 = arith.extui %53 : i1 to i32
    %c0_i32 = arith.constant 0 : i32
    %55 = arith.cmpi ne, %54, %c0_i32 : i32
    scf.if %55 {
      %59 = vector.shape_cast %50 : vector<8x128xf32> to vector<1x8x128xf32>
      %cst_23 = arith.constant dense<0.000000e+00> : vector<8x128xf32>
      %60 = vector.multi_reduction <add>, %59, %cst_23 [0] : vector<1x8x128xf32> to vector<8x128xf32>
      %c0_24 = arith.constant 0 : index
      %c0_25 = arith.constant 0 : index
      %c0_26 = arith.constant 0 : index
      %61 = vector.load %arg6[%c0_24, %c0_25, %c0_26] : memref<1x8x128xf32, #tpu.memory_space<vmem>>, vector<1x8x128xf32>
      %62 = vector.shape_cast %61 : vector<1x8x128xf32> to vector<8x128xf32>
      %63 = vector.shape_cast %60 : vector<8x128xf32> to vector<1x8x128xf32>
      tpu.vector_store %arg6[%c0_24, %c0_25, %c0_26], %63 {strides = array<i32>} : memref<1x8x128xf32, #tpu.memory_space<vmem>>, vector<1x8x128xf32>,
    } else {
    }
    %true = arith.constant true
    %56 = arith.xori %53, %true : i1
    %57 = arith.extui %56 : i1 to i32
    %c0_i32_22 = arith.constant 0 : i32
    %58 = arith.cmpi ne, %57, %c0_i32_22 : i32
    scf.if %58 {
      %c2000_i32_23 = arith.constant 2000 : i32
      %59 = arith.subi %c2000_i32_23, %51 : i32
      %60 = tpu.iota {dimensions = array<i32: 0>} : vector<8x128xi32>
      %61 = tpu.iota {dimensions = array<i32: 1>} : vector<8x128xi32>
      %c128_i32 = arith.constant 128 : i32
      %62 = vector.broadcast %c128_i32 : i32 to vector<8x128xi32>
      %63 = arith.muli %60, %62 : vector<8x128xi32>
      %64 = arith.addi %63, %61 : vector<8x128xi32>
      %65 = vector.broadcast %59 : i32 to vector<8x128xi32>
      %66 = arith.cmpi slt, %64, %65 : vector<8x128xi32>
      %cst_24 = arith.constant 0.000000e+00 : f32
      %67 = vector.broadcast %cst_24 : f32 to vector<8x128xf32>
      %68 = arith.select %66, %50, %67 : vector<8x128xi1>, vector<8x128xf32>
      %69 = vector.shape_cast %68 : vector<8x128xf32> to vector<1x8x128xf32>
      %cst_25 = arith.constant dense<0.000000e+00> : vector<8x128xf32>
      %70 = vector.multi_reduction <add>, %69, %cst_25 [0] : vector<1x8x128xf32> to vector<8x128xf32>
      %c0_26 = arith.constant 0 : index
      %c0_27 = arith.constant 0 : index
      %c0_28 = arith.constant 0 : index
      %71 = vector.load %arg6[%c0_26, %c0_27, %c0_28] : memref<1x8x128xf32, #tpu.memory_space<vmem>>, vector<1x8x128xf32>
      %72 = vector.shape_cast %71 : vector<1x8x128xf32> to vector<8x128xf32>
      %73 = vector.shape_cast %70 : vector<8x128xf32> to vector<1x8x128xf32>
      tpu.vector_store %arg6[%c0_26, %c0_27, %c0_28], %73 {strides = array<i32>} : memref<1x8x128xf32, #tpu.memory_space<vmem>>, vector<1x8x128xf32>,
    } else {
    }
    return
  }
  func.func @transform_0(%arg0: i32) -> (i32, i32) {
    %c0_i32 = arith.constant 0 : i32
    %c0_i32_0 = arith.constant 0 : i32
    return %arg0, %c0_i32 : i32, i32
  }
  func.func @transform_1(%arg0: i32) -> (i32, i32) {
    %c0_i32 = arith.constant 0 : i32
    %c0_i32_0 = arith.constant 0 : i32
    return %arg0, %c0_i32 : i32, i32
  }
  func.func @transform_2(%arg0: i32) -> (i32, i32) {
    %c0_i32 = arith.constant 0 : i32
    %c0_i32_0 = arith.constant 0 : i32
    return %arg0, %c0_i32 : i32, i32
  }
  func.func @transform_3(%arg0: i32) -> (i32, i32) {
    %c0_i32 = arith.constant 0 : i32
    %c0_i32_0 = arith.constant 0 : i32
    return %arg0, %c0_i32 : i32, i32
  }
  func.func @transform_4(%arg0: i32) -> (i32, i32) {
    %c0_i32 = arith.constant 0 : i32
    %c0_i32_0 = arith.constant 0 : i32
    return %arg0, %c0_i32 : i32, i32
  }
  func.func @transform_5(%arg0: i32) -> (i32, i32, i32) {
    %c0_i32 = arith.constant 0 : i32
    %c0_i32_0 = arith.constant 0 : i32
    %c0_i32_1 = arith.constant 0 : i32
    return %arg0, %c0_i32, %c0_i32_0 : i32, i32, i32
  }
}

</mosaic_0001>

<bundles_post_ra>
// kernel: tpu_custom_call.1
= control target key start
LH: loop header
LB: loop body
LE: loop exit
PB: predicated region body
PF: predicated region fallthrough
CT: control target
= control target key end

     0   :  { %s1273_s0 = inlined_call_operand.hbm [shape: f32[16,128], index: 0, kind: input, shape index: {}]   ;;  %s1274_s1 = inlined_call_operand.hbm [shape: f32[16,128], index: 1, kind: input, shape index: {}]   ;;  %s1275_s2 = inlined_call_operand.hbm [shape: f32[16,128], index: 2, kind: input, shape index: {}]   ;;  %s1276_s3 = inlined_call_operand.hbm [shape: f32[16,128], index: 3, kind: input, shape index: {}]   ;;  %s1277_s4 = inlined_call_operand.hbm [shape: f32[16,128], index: 4, kind: input, shape index: {}]   ;;  %s1278_s5 = inlined_call_operand.hbm [shape: f32[2,8,128], index: 5, kind: output, shape index: {}]  }
   0x1   :  { %1287 = sst [smem:[#allocation20_spill]] %s1273_s0 }
   0x2   :  { %1288 = sst [smem:[#allocation21_spill]] %s1274_s1 }
   0x3   :  { %1289 = sst [smem:[#allocation22_spill]] %s1276_s3 }
   0x4   :  { %10 = vsyncpa [#allocation3], 0 }
   0x5   :  { %12 = vsyncpa [#allocation3 + $0x1], 0 }
   0x6   :  { %13 = vsyncpa [#allocation6], 0 }
   0x7   :  { %15 = vsyncpa [#allocation6 + $0x1], 0 }
   0x8   :  { %16 = vsyncpa [#allocation9], 0 }
   0x9   :  { %18 = vsyncpa [#allocation9 + $0x1], 0 }
   0xa   :  { %19 = vsyncpa [#allocation4], 0 }
   0xb   :  { %21 = vsyncpa [#allocation4 + $0x1], 0  ;;  %s989_s18 = smov 0   ;;  %s991_s19 = smov 0  }
   0xc   :  { %s993_s20 = smov 0   ;;  %s995_s21 = smov 0  }
   0xd LB: > { %1290 = sst [smem:[#allocation16_spill]] %s951_s21  ;;  %s1010_s22 = sadd.s32 4294967295, %s951_s21   ;;  %s951_s21 = sphi %s995_s21, %s1313_s21   ;;  %s947_s20 = sphi %s993_s20, %s1317_s20   ;;  %s943_s19 = sphi %s991_s19, %s1316_s19   ;;  %s939_s18 = sphi %s989_s18, %s1315_s18  }
   0xe   : > { %s634_s23 = sadd.s32 4294967294, %s951_s21   ;;  %s1014_s24 = sadd.s32 1, %s951_s21  }
   0xf   : > { %1291 = sst [smem:[#allocation17_spill]] %s1014_s24  ;;  %s34_s25 = sadd.s32 1, %s947_s20 }
  0x10   : > { %s31_s26 = ssub.s32 %s951_s21, %s1014_s24  ;;  %p41_p0 = scmp.ne.s32.totalorder %s947_s20, %s943_s19 }
  0x11   : > { %p32_p1 = scmp.eq.s32.totalorder %s31_s26, 0  ;;  %p42_p2 = scmp.eq.s32.totalorder %s951_s21, 0 }
  0x12   : > { %p47_p3 = scmp.ne.s32.totalorder %s943_s19, %s939_s18  ;;  %p48_p4 = scmp.eq.s32.totalorder %s1010_s22, 0 }
  0x13   : > { %s1026_s27 = scalar_select %p32_p1, %s947_s20, %s34_s25  }
  0x14   : > { %p43_p5 = por %p42_p2, %p41_p0  ;;  %p1028_p6 = por %p48_p4, %p47_p3 }
  0x15   : > { %1292 = sst [smem:[#allocation18_spill]] %s1026_s27  ;;  %p175_p7 = scmp.eq.s32.totalorder %s1010_s22, 1 }
  0x16   : > { %s1293_s28 = scalar_select %p1028_p6, 1, 0 }
  0x17   : > { %p181_p8 = scmp.eq.s32.totalorder %s634_s23, 1  ;;  %p693_p10 = scmp.lt.s32.totalorder %s951_s21, 2 }
  0x18   : > { %p1035_p11 = por %p175_p7, %p41_p0  ;;  %s1279_s6 = sand.u32 1, %s947_s20  }
  0x19   : > { %p1039_p12 = por %p181_p8, %p47_p3  ;;  %s1045_s7 = sshll.u32 %s951_s21, 7 }
  0x1a   : > { %s1294_s29 = scalar_select %p1035_p11, 1, 0 }
  0x1b   : > { %s1295_s30 = scalar_select %p1039_p12, 1, 0 }
  0x1c   : > { %s1049_s8 = sshll.u32 %s1279_s6, 3  ;;  %p1051_p13 = pnand %p693_p10, %p43_p5 }
  0x1d   : > { %1296 = sst [smem:[#allocation19_spill]] %s1295_s30  ;;  %s1280_s10 = sand.u32 1, %s951_s21  }
  0x1e   : > { %s1298_s1 = sld [smem:[#allocation21_spill]]  ;;  %s223_s14 = scalar_lea.vmem [#allocation5], %s1049_s8 }
  0x1f   : > { %s230_s15 = sshll.u32 %s223_s14, 4  ;;  %s1066_s16 = scalar_lea.sflag [#allocation6], %s1280_s10  ;;  %s231_s15 = int_to_ptr.vmem [resolvable:$true] %s230_s15 }
  0x20   : > { %p1072_p2 = pneg %p1051_p13 }
  0x24   : > { %s1060_s13 = scalar_lea.hbm %s1298_s1, %s1045_s7  ;;  %s744_s11 = scalar_lea.hbm %s1298_s1, 256 }
  0x25   : > { %s739_s17 = scalar_lea.hbm %s1060_s13, 128  ;;  %p745_p5 = scmp.lt.s32.totalorder %s1060_s13, %s1298_s1 }
  0x26   : > { %p740_p1 = scmp.ne.s32.totalorder %s1060_s13, %s739_s17  ;;  %p746_p7 = scmp.lt.s32.totalorder %s744_s11, %s739_s17 }
  0x28   : > { %p742_p3 = pnand %p1072_p2, %p740_p1  ;;  %p747_p8 = por %p746_p7, %p745_p5 }
  0x2a   : > { %p743_p4 = pneg %p742_p3 }
  0x2c   : > { %p748_p10 = pnand %p747_p8, %p743_p4 }
  0x2e   : > { %751 = shalt.err (!%p748_p10)
}
  0x2f   : > { %s752_s6 = scalar_lea.vmem %s231_s15, 128  ;;  %s953_s10 = smov [#allocation5]  }
  0x30   : > { %p753_p9 = scmp.ne.s32.totalorder %s231_s15, %s752_s6  ;;  %s757_s27 = sshll.u32 %s953_s10, 4  ;;  %s758_s27 = int_to_ptr.vmem [resolvable:$false] %s757_s27 }
  0x31   : > { %s759_s24 = scalar_lea.vmem %s758_s27, 256  ;;  %p760_p1 = scmp.lt.s32.totalorder %s231_s15, %s758_s27 }
  0x32   : > { %p755_p0 = pnand %p753_p9, %p1072_p2  ;;  %p761_p3 = scmp.lt.s32.totalorder %s759_s24, %s752_s6 }
  0x34   : > { %p756_p12 = pneg %p755_p0  ;;  %p762_p11 = por %p761_p3, %p760_p1 }
  0x36   : > { %p763_p6 = pnand %p762_p11, %p756_p12 }
  0x38   : > { %766 = shalt.err (!%p763_p6)
}
  0x39   : > { %679 = dma.hbm_to_vmem [thread:$0]  (!%p1051_p13), %s1060_s13, 128, %s231_s15, %s1066_s16  }
  0x3a   : > { %p289_p9 = scmp.lt.s32.totalorder %s951_s21, 3  ;;  %s1300_s3 = sld [smem:[#allocation22_spill]] }
  0x3b   : > { %p1301_p0 = scmp.ge.s32.totalorder %s951_s21, 1  ;;  %s259_s6 = scalar_lea.vmem [#allocation8], %s1049_s8 }
  0x3c   : > { %s266_s25 = sshll.u32 %s259_s6, 4  ;;  %s1303_s26 = sand.u32 1, %s951_s21   ;;  %s267_s25 = int_to_ptr.vmem [resolvable:$true] %s266_s25 }
  0x3d   : > { %p1100_p6 = pnand %p1301_p0, %p289_p9  ;;  %s1107_s11 = scalar_lea.sflag [#allocation9], %s1303_s26 }
  0x3f   : > { %s1302_s24 = scalar_select %p1100_p6, 1, 0 }
  0x40   : > { %s1096_s27 = scalar_lea.hbm %s1300_s3, %s1045_s7  ;;  %s772_s14 = scalar_lea.hbm %s1300_s3, 256 }
  0x41   : > { %s767_s13 = scalar_lea.hbm %s1096_s27, 128  ;;  %p773_p5 = scmp.lt.s32.totalorder %s1096_s27, %s1300_s3 }
  0x42   : > { %p768_p11 = scmp.ne.s32.totalorder %s1096_s27, %s767_s13  ;;  %p774_p7 = scmp.lt.s32.totalorder %s772_s14, %s767_s13 }
  0x44   : > { %p770_p12 = pnand %p768_p11, %p1072_p2  ;;  %p775_p8 = por %p774_p7, %p773_p5 }
  0x46   : > { %p771_p4 = pneg %p770_p12 }
  0x48   : > { %p776_p10 = pnand %p775_p8, %p771_p4 }
  0x4a   : > { %779 = shalt.err (!%p776_p10)
}
  0x4b   : > { %s780_s6 = scalar_lea.vmem %s267_s25, 128  ;;  %s954_s26 = smov [#allocation8]  }
  0x4c   : > { %p781_p1 = scmp.ne.s32.totalorder %s267_s25, %s780_s6  ;;  %s785_s1 = sshll.u32 %s954_s26, 4  ;;  %s786_s1 = int_to_ptr.vmem [resolvable:$false] %s785_s1 }
  0x4d   : > { %s787_s21 = scalar_lea.vmem %s786_s1, 256  ;;  %p788_p0 = scmp.lt.s32.totalorder %s267_s25, %s786_s1 }
  0x4e   : > { %p783_p3 = pnand %p781_p1, %p1072_p2  ;;  %p789_p11 = scmp.lt.s32.totalorder %s787_s21, %s780_s6 }
  0x50   : > { %p784_p9 = pneg %p783_p3  ;;  %p790_p12 = por %p789_p11, %p788_p0 }
  0x52   : > { %p791_p6 = pnand %p790_p12, %p784_p9 }
  0x54   : > { %794 = shalt.err (!%p791_p6)
}
  0x55   : > { %685 = dma.hbm_to_vmem [thread:$0]  (!%p1051_p13), %s1096_s27, 128, %s267_s25, %s1107_s11  }
  0x56   : > { %s1304_s0 = sld [smem:[#allocation20_spill]]  ;;  %s205_s1 = scalar_lea.vmem [#allocation2], %s1049_s8 }
  0x57   : > { %s212_s21 = sshll.u32 %s205_s1, 4  ;;  %s1137_s17 = scalar_lea.hbm %s1275_s2, %s1045_s7  ;;  %s213_s21 = int_to_ptr.vmem [resolvable:$true] %s212_s21 }
  0x58   : > { %s1305_s6 = sand.u32 1, %s947_s20  }
  0x59   : > { %s202_s26 = scalar_lea.sflag [#allocation3], %s1305_s6 }
  0x5c   : > { %s1130_s12 = scalar_lea.hbm %s1304_s0, %s1045_s7  ;;  %s800_s13 = scalar_lea.hbm %s1304_s0, 256 }
  0x5d   : > { %s795_s3 = scalar_lea.hbm %s1130_s12, 128  ;;  %p801_p7 = scmp.lt.s32.totalorder %s1130_s12, %s1304_s0 }
  0x5e   : > { %p796_p6 = scmp.ne.s32.totalorder %s1130_s12, %s795_s3  ;;  %p802_p8 = scmp.lt.s32.totalorder %s800_s13, %s795_s3 }
  0x60   : > { %p798_p4 = pnand %p796_p6, %p1072_p2  ;;  %p803_p10 = por %p802_p8, %p801_p7 }
  0x62   : > { %p799_p5 = pneg %p798_p4 }
  0x64   : > { %p804_p1 = pnand %p803_p10, %p799_p5 }
  0x66   : > { %807 = shalt.err (!%p804_p1)
}
  0x67   : > { %s808_s1 = scalar_lea.vmem %s213_s21, 128  ;;  %s955_s14 = smov [#allocation2]  }
  0x68   : > { %p809_p3 = scmp.ne.s32.totalorder %s213_s21, %s808_s1  ;;  %s813_s10 = sshll.u32 %s955_s14, 4  ;;  %s814_s10 = int_to_ptr.vmem [resolvable:$false] %s813_s10 }
  0x69   : > { %s815_s6 = scalar_lea.vmem %s814_s10, 256  ;;  %p816_p11 = scmp.lt.s32.totalorder %s213_s21, %s814_s10 }
  0x6a   : > { %p811_p9 = pnand %p809_p3, %p1072_p2  ;;  %p817_p12 = scmp.lt.s32.totalorder %s815_s6, %s808_s1 }
  0x6c   : > { %p812_p0 = pneg %p811_p9  ;;  %p818_p6 = por %p817_p12, %p816_p11 }
  0x6e   : > { %p819_p4 = pnand %p818_p6, %p812_p0 }
  0x70   : > { %822 = shalt.err (!%p819_p4)
}
  0x71   : > { %676 = dma.hbm_to_vmem [thread:$0]  (!%p1051_p13), %s1130_s12, 128, %s213_s21, %s202_s26  }
  0x72   : > { %s241_s3 = scalar_lea.vmem [#allocation7], %s1049_s8  ;;  %s1162_s13 = scalar_lea.hbm %s1277_s4, %s1045_s7 }
  0x73   : > { %s248_s30 = sshll.u32 %s241_s3, 4  ;;  %s823_s15 = scalar_lea.hbm %s1137_s17, 128  ;;  %s249_s30 = int_to_ptr.vmem [resolvable:$true] %s248_s30 }
  0x74   : > { %p824_p5 = scmp.ne.s32.totalorder %s1137_s17, %s823_s15  ;;  %s828_s10 = scalar_lea.hbm %s1275_s2, 256 }
  0x75   : > { %p829_p10 = scmp.lt.s32.totalorder %s1137_s17, %s1275_s2  ;;  %p830_p1 = scmp.lt.s32.totalorder %s828_s10, %s823_s15 }
  0x76   : > { %p826_p7 = pnand %p824_p5, %p1072_p2 }
  0x77   : > { %p831_p3 = por %p830_p1, %p829_p10 }
  0x78   : > { %p827_p8 = pneg %p826_p7 }
  0x7a   : > { %p832_p9 = pnand %p831_p3, %p827_p8 }
  0x7c   : > { %835 = shalt.err (!%p832_p9)
}
  0x7d   : > { %s836_s12 = scalar_lea.vmem %s249_s30, 128  ;;  %s956_s7 = smov [#allocation7]  }
  0x7e   : > { %p837_p0 = scmp.ne.s32.totalorder %s249_s30, %s836_s12  ;;  %s841_s21 = sshll.u32 %s956_s7, 4  ;;  %s842_s21 = int_to_ptr.vmem [resolvable:$false] %s841_s21 }
  0x7f   : > { %s843_s26 = scalar_lea.vmem %s842_s21, 256  ;;  %p844_p6 = scmp.lt.s32.totalorder %s249_s30, %s842_s21 }
  0x80   : > { %p839_p11 = pnand %p837_p0, %p1072_p2  ;;  %p845_p4 = scmp.lt.s32.totalorder %s843_s26, %s836_s12 }
  0x82   : > { %p840_p12 = pneg %p839_p11  ;;  %p846_p5 = por %p845_p4, %p844_p6 }
  0x84   : > { %p847_p7 = pnand %p846_p5, %p840_p12 }
  0x86   : > { %850 = shalt.err (!%p847_p7)
}
  0x87   : > { %682 = dma.hbm_to_vmem [thread:$0]  (!%p1051_p13), %s1137_s17, 128, %s249_s30, %s1066_s16  }
  0x88   : > { %s277_s0 = scalar_lea.vmem [#allocation10], %s1049_s8  ;;  %s851_s27 = scalar_lea.hbm %s1162_s13, 128 }
  0x89   : > { %s284_s3 = sshll.u32 %s277_s0, 4  ;;  %p852_p8 = scmp.ne.s32.totalorder %s1162_s13, %s851_s27  ;;  %s285_s3 = int_to_ptr.vmem [resolvable:$true] %s284_s3 }
  0x8a   : > { %s856_s1 = scalar_lea.hbm %s1277_s4, 256  ;;  %p857_p3 = scmp.lt.s32.totalorder %s1162_s13, %s1277_s4 }
  0x8b   : > { %p854_p10 = pnand %p852_p8, %p1072_p2  ;;  %p858_p9 = scmp.lt.s32.totalorder %s856_s1, %s851_s27 }
  0x8d   : > { %p855_p1 = pneg %p854_p10  ;;  %p859_p0 = por %p858_p9, %p857_p3 }
  0x8f   : > { %p860_p11 = pnand %p859_p0, %p855_p1 }
  0x91   : > { %863 = shalt.err (!%p860_p11)
}
  0x92   : > { %s864_s8 = scalar_lea.vmem %s285_s3, 128  ;;  %s957_s16 = smov [#allocation10]  }
  0x93   : > { %p865_p12 = scmp.ne.s32.totalorder %s285_s3, %s864_s8  ;;  %s869_s17 = sshll.u32 %s957_s16, 4  ;;  %s870_s17 = int_to_ptr.vmem [resolvable:$false] %s869_s17 }
  0x94   : > { %s871_s30 = scalar_lea.vmem %s870_s17, 256  ;;  %p872_p5 = scmp.lt.s32.totalorder %s285_s3, %s870_s17 }
  0x95   : > { %p867_p6 = pnand %p865_p12, %p1072_p2  ;;  %p873_p7 = scmp.lt.s32.totalorder %s871_s30, %s864_s8 }
  0x97   : > { %p868_p4 = pneg %p867_p6  ;;  %p874_p8 = por %p873_p7, %p872_p5 }
  0x99   : > { %p875_p10 = pnand %p874_p8, %p868_p4 }
  0x9b   : > { %878 = shalt.err (!%p875_p10)
}
  0x9c   : > { %688 = dma.hbm_to_vmem [thread:$0]  (!%p1051_p13), %s1162_s13, 128, %s285_s3, %s1107_s11  }
  0x9d   : > { %p1306_p1 = scmp.ne.s32.totalorder %s1302_s24, 0 }
  0x9e   : > { %s1202_s23 = sand.u32 (!%p1306_p1), 1, %s943_s19   ;;  %p1307_p2 = scmp.ne.s32.totalorder (!%p1306_p1), %s1293_s28, 0 }
  0x9f   : > { %293 = sbr.rel (%p1306_p1) target bundleno = 296 (0x128), region = 40  ;;  %s1205_s6 = sshll.u32 (!%p1306_p1), %s1202_s23, 3 }
  0xa0   : > { %s296_s12 = scalar_lea.sflag (!%p1306_p1), [#allocation3], %s1202_s23  ;;  %s299_s7 = scalar_lea.vmem (!%p1306_p1), [#allocation2], %s1205_s6 }
  0xa4   : > { %922 = dma.done.wait (%p1307_p2), %s296_s12, 128  }
  0xa5   : > { %924 = vsyncadd (%p1307_p2), %s296_s12, 4294967168  ;;  %s304_s9 = sand.u32 1, %s1010_s22   ;;  %s308_s11 = scalar_lea.vmem [#allocation5], %s1205_s6 }
  0xa6   : > { %s305_s24 = scalar_lea.sflag [#allocation6], %s304_s9 }
  0xa7   : > { %926 = dma.done.wait (%p1307_p2), %s305_s24, 256  }
  0xa8   : > { %928 = vsyncadd (%p1307_p2), %s305_s24, 4294967040  ;;  %s317_s13 = scalar_lea.vmem [#allocation7], %s1205_s6  ;;  %s323_s21 = scalar_lea.sflag [#allocation9], %s304_s9 }
  0xa9   : > { %s326_s26 = scalar_lea.vmem [#allocation8], %s1205_s6 }
  0xaa   : > { %930 = dma.done.wait (%p1307_p2), %s323_s21, 256  }
  0xab   : > { %932 = vsyncadd (%p1307_p2), %s323_s21, 4294967040  ;;  %s654_s0 = sshll.u32 %s1010_s22, 10  ;;  %v383_v0 = vld [vmem:[%s308_s11] sm:$0xff]  ;;  %v384_v1 = vld [vmem:[%s317_s13] sm:$0xff]  ;;  %s335_s28 = scalar_lea.vmem [#allocation10], %s1205_s6 }
  0xac   : > { %s1228_s3 = sadd.s32 1024, %s654_s0  ;;  %v385_v2 = vld [vmem:[%s326_s26] sm:$0xff]  ;;  %v393_v3 = vand.u32 2147483647, %v384_v1  ;;  %v392_v22 = vmax.f32 %v384_v1, 0.0  ;;  %v387_v37 = vmul.f32 %v383_v0, %v383_v0  ;;  %v382_v41 = vld [vmem:[%s299_s7] sm:$0xff] }
  0xad   : > { %v413_v4 = vsub.f32 %v385_v2, %v383_v0  ;;  %v388_v33 = vmul.f32 2.0, %v385_v2  ;;  %v391_v44 = vmul.f32 5.0, %v382_v41  ;;  %v386_v48 = vld [vmem:[%s335_s28] sm:$0xff]  ;;  %s381_s27 = scalar_lea.vmem [#allocation11], %s1205_s6  ;;  %p655_p13 = scmp.gt.s32.totalorder %s1228_s3, 2000 }
  0xae   : > { %v394_v5 = vsub.f32 0.0, %v393_v3  ;;  %v437_v50 = vsub.f32 1.0, %v386_v48 }
  0xaf   : > { %v414_v6 = vmul.f32 0.2, %v413_v4  ;;  %v389_v38 = vmul.f32 %v388_v33, %v383_v0 }
  0xb0   : > { %v395_v7 = vmul.f32 1.442695, %v394_v5 }
  0xb1   : > { %v415_v8 = vadd.f32 %v414_v6, %v384_v1  ;;  %v390_v43 = vsub.f32 %v387_v37, %v389_v38 }
  0xb2   : > { %727 = vpow2.f32 %v395_v7 }
  0xb3   : > { %v416_v9 = vmul.f32 1.0206207, %v415_v8  ;;  %v434_v47 = vadd.f32 %v391_v44, %v390_v43 }
  0xb5   : > { %v417_v10 = vsub.f32 0.0, %v416_v9 }
  0xb7   : > { %v419_v11 = vand.u32 2147483647, %v417_v10  ;;  %v418_v40 = vmax.f32 %v417_v10, 0.0 }
  0xb9   : > { %v420_v12 = vsub.f32 0.0, %v419_v11 }
  0xbb   : > { %v421_v13 = vmul.f32 1.442695, %v420_v12 }
  0xbd   : > { %729 = vpow2.f32 %v421_v13 }
  0xbf   : > { %v728_v14 = vpop.eup %727 }
  0xc0   : > { %v397_v15 = vadd.f32 1.0, %v728_v14  ;;  %v400_v16 = vmul.f32 -0.5, %v728_v14  ;;  %v403_v18 = vand.u32 2147483647, %v728_v14 }
  0xc2   : > { %731 = vlog2.f32 %v397_v15  ;;  %v401_v17 = vadd.f32 1.0, %v400_v16  ;;  %vm404_vm0 = vcmp.lt.f32.partialorder %v403_v18, 0.0004427343 }
  0xc4   : > { %v402_v20 = vmul.f32 %v728_v14, %v401_v17 }
  0xca   : > { %v730_v19 = vpop.eup %729 }
  0xcb   : > { %v423_v24 = vadd.f32 1.0, %v730_v19  ;;  %v426_v29 = vmul.f32 -0.5, %v730_v19  ;;  %v429_v32 = vand.u32 2147483647, %v730_v19 }
  0xcd   : > { %733 = vlog2.f32 %v423_v24  ;;  %v427_v30 = vadd.f32 1.0, %v426_v29  ;;  %vm430_vm1 = vcmp.lt.f32.partialorder %v429_v32, 0.0004427343 }
  0xcf   : > { %v732_v21 = vpop.eup %731  ;;  %v428_v35 = vmul.f32 %v730_v19, %v427_v30 }
  0xd0   : > { %v399_v23 = vmul.f32 0.6931472, %v732_v21 }
  0xd2   : > { %v405_v25 = vsel %vm404_vm0, %v402_v20, %v399_v23 }
  0xd3   : > { %v406_v26 = vadd.f32 %v405_v25, %v392_v22 }
  0xd5   : > { %v407_v27 = vsub.f32 0.0, %v406_v26 }
  0xd7   : > { %v408_v28 = vmul.f32 1.442695, %v407_v27 }
  0xd9   : > { %735 = vpow2.f32 %v408_v28 }
  0xda   : > { %v734_v31 = vpop.eup %733 }
  0xdb   : > { %v425_v34 = vmul.f32 0.6931472, %v734_v31 }
  0xdd   : > { %v431_v42 = vsel %vm430_vm1, %v428_v35, %v425_v34 }
  0xde   : > { %v432_v45 = vadd.f32 %v431_v42, %v418_v40 }
  0xe0   : > { %v433_v46 = vsub.f32 0.0, %v432_v45 }
  0xe2   : > { %v435_v49 = vsub.f32 %v434_v47, %v433_v46 }
  0xe4   : > { %v436_v53 = vmul.f32 %v435_v49, %v386_v48 }
  0xe6   : > { %v736_v36 = vpop.eup %735 }
  0xe7   : > { %v410_v39 = vadd.f32 1e-08, %v736_v36 }
  0xe9   : > { %737 = vlog2.f32 %v410_v39 }
  0xf6   : > { %v738_v51 = vpop.eup %737 }
  0xf7   : > { %v412_v52 = vmul.f32 0.6931472, %v738_v51  ;;  %445 = sbr.rel (%p655_p13) target bundleno = 254 (0xfe), region = 64 }
  0xf9   : > { %v438_v54 = vmul.f32 %v437_v50, %v412_v52 }
  0xfb   : > { %v439_v55 = vsub.f32 %v436_v53, %v438_v54 }
  0xfd   : > { %447 = vst [vmem:[%s381_s27] sm:$0xff] %v439_v55 }
  0xfe PF: > { %p656_p3 = scmp.le.s32.totalorder %s1228_s3, 2000 }
  0xff   : > { %s452_s25 = ssub.s32 (!%p656_p3), 2000, %s654_s0 }
 0x100   : > { %451 = sbr.rel (%p656_p3) target bundleno = 272 (0x110), region = 68 }
 0x105   : > { %v453_v56 = vlaneseq  ;;  %v459_v60 = vstv %s452_s25 }
 0x107   : > { %v454_v57 = vshrl.u32 %v453_v56, 7  ;;  %v456_v58 = vand.u32 127, %v453_v56 }
 0x109   : > { %v457_v59 = vmul.u32 128, %v454_v57 }
 0x10b   : > { %v458_v61 = vadd.s32 %v457_v59, %v456_v58 }
 0x10d   : > { %vm460_vm2 = vcmp.lt.s32.totalorder %v458_v61, %v459_v60 }
 0x10e   : > { %v461_v62 = vsel %vm460_vm2, %v439_v55, 0.0 }
 0x10f   : > { %463 = vst [vmem:[%s381_s27] sm:$0xff] %v461_v62 }
 0x110 PF: > { %s658_s15 = sshll.u32 %s1010_s22, 7  ;;  %s478_s8 = sshll.u32 %s381_s27, 4  ;;  %s479_s8 = int_to_ptr.vmem [resolvable:$true] %s478_s8 }
 0x111   : > { %s476_s10 = scalar_lea.hbm %s1278_s5, %s658_s15  ;;  %s465_s16 = scalar_lea.sflag [#allocation4], %s1202_s23 }
 0x112   : > { %s879_s17 = scalar_lea.vmem %s479_s8, 128  ;;  %p1308_p0 = scmp.ne.s32.totalorder %s1294_s29, 0 }
 0x113   : > { %p880_p9 = scmp.ne.s32.totalorder %s479_s8, %s879_s17  ;;  %s958_s30 = smov [#allocation11]  }
 0x114   : > { %s883_s6 = sshll.u32 %s958_s30, 4  ;;  %s884_s6 = int_to_ptr.vmem [resolvable:$false] %s883_s6 }
 0x115   : > { %p881_p11 = pnand %p880_p9, %p1308_p0  ;;  %s885_s12 = scalar_lea.vmem %s884_s6, 256 }
 0x116   : > { %p886_p6 = scmp.lt.s32.totalorder %s479_s8, %s884_s6  ;;  %p887_p4 = scmp.lt.s32.totalorder %s885_s12, %s879_s17 }
 0x117   : > { %p882_p12 = pneg %p881_p11 }
 0x118   : > { %p888_p5 = por %p887_p4, %p886_p6 }
 0x11a   : > { %p889_p7 = pnand %p888_p5, %p882_p12 }
 0x11c   : > { %892 = shalt.err (!%p889_p7)
}
 0x11d   : > { %s893_s22 = scalar_lea.hbm %s476_s10, 128  ;;  %s897_s9 = scalar_lea.hbm %s1278_s5, 256 }
 0x11e   : > { %p894_p8 = scmp.ne.s32.totalorder %s476_s10, %s893_s22  ;;  %p898_p2 = scmp.lt.s32.totalorder %s476_s10, %s1278_s5 }
 0x11f   : > { %p899_p13 = scmp.lt.s32.totalorder %s897_s9, %s893_s22 }
 0x120   : > { %p895_p10 = pnand %p894_p8, %p1308_p0 }
 0x121   : > { %p900_p3 = por %p899_p13, %p898_p2 }
 0x122   : > { %p896_p1 = pneg %p895_p10 }
 0x124   : > { %p901_p9 = pnand %p900_p3, %p896_p1 }
 0x126   : > { %904 = shalt.err (!%p901_p9)
}
 0x127   : > { %671 = dma.vmem_to_hbm [thread:$0]  (%p1308_p0), %s479_s8, 128, %s476_s10, %s465_s16  }
 0x128 PF: > { %s1309_s13 = sld [smem:[#allocation19_spill]]  ;;  %s490_s26 = sand.u32 1, %s939_s18  }
 0x129   : > { %s1310_s21 = sld [smem:[#allocation16_spill]]  ;;  %s491_s0 = scalar_lea.sflag [#allocation4], %s490_s26 }
 0x12e   : > { %p1311_p11 = scmp.ne.s32.totalorder %s1309_s13, 0 }
 0x12f   : > { %p1312_p12 = scmp.ge.s32.totalorder %s1310_s21, 2 }
 0x131   : > { %p690_p6 = pnand %p1312_p12, %p1311_p11 }
 0x133   : > { %p691_p4 = pneg %p690_p6 }
 0x135   : > { %934 = dma.done.wait (%p691_p4), %s491_s0, 128  }
 0x136   : > { %936 = vsyncadd (%p691_p4), %s491_s0, 4294967168  ;;  %s1313_s21 = sld [smem:[#allocation17_spill]]  ;;  %s1315_s18 = smov %s943_s19 }
 0x137   : > { %s1314_s3 = sld [smem:[#allocation18_spill]]  ;;  %s1316_s19 = smov %s947_s20 }
 0x13c   : > { %p24_p5 = scmp.ge.s32.totalorder %s1313_s21, 4  }
 0x13d   : > { %s1317_s20 = smov %s1314_s3 }
 0x13e   :  { %26 = sbr.rel (!%p24_p5) target bundleno = 13 (0xd), region = 141 }
 0x143   :  { %496 = vsyncpa [#allocation3], 1 }
 0x144   :  { %498 = vsyncpa [#allocation3 + $0x1], 1 }
 0x145   :  { %499 = vsyncpa [#allocation6], 1 }
 0x146   :  { %501 = vsyncpa [#allocation6 + $0x1], 1 }
 0x147   :  { %502 = vsyncpa [#allocation9], 1 }
 0x148   :  { %504 = vsyncpa [#allocation9 + $0x1], 1 }
 0x149   :  { %505 = vsyncpa [#allocation4], 1 }
 0x14a   :  { %507 = vsyncpa [#allocation4 + $0x1], 1 }

</bundles_post_ra>
